<compile_context>
chip_gen: v7x
topology: tpu7x:2x2x1
jax: 0.10.0
libtpu: 0.0.40
codegen_flags: <defaults>
</compile_context>

<pallas_src>
from functools import partial

import numpy as np
import jax
import jax.numpy as jnp
from jax.experimental import pallas as pl
from jax.experimental.pallas import tpu as pltpu


def unigram_kernel(x_ref, logp_ref, o_ref, acc_ref, *, vocab: int, tokens: int):
    # x_ref:    (v_tile, t_tile) f32 VMEM   (vocab on sublanes, tokens on lanes)
    # logp_ref: (v_tile, 1)      f32 VMEM   (log p column block)
    # o_ref:    (1, 1)           f32 SMEM   (scalar output)
    # acc_ref:  (v_tile, t_tile) f32 VMEM scratch (persistent accumulator)
    v = pl.program_id(0)
    t = pl.program_id(1)
    n_v = pl.num_programs(0)
    n_t = pl.num_programs(1)
    v_tile, t_tile = x_ref.shape

    @pl.when((v == 0) & (t == 0))
    def _init():
        acc_ref[...] = jnp.zeros_like(acc_ref)
        o_ref[0, 0] = 0.0

    # (v_tile, t_tile) * (v_tile, 1): lane broadcast, pure VPU work.
    contrib = x_ref[...] * logp_ref[...]

    # Mask out-of-bounds rows/cols of partial edge tiles; statically elided
    # (no code emitted) whenever the tile divides the dimension.
    mask = None
    if vocab % v_tile:
        rows = v * v_tile + jax.lax.broadcasted_iota(jnp.int32, (v_tile, t_tile), 0)
        mask = rows < vocab
    if tokens % t_tile:
        cols = t * t_tile + jax.lax.broadcasted_iota(jnp.int32, (v_tile, t_tile), 1)
        cmask = cols < tokens
        mask = cmask if mask is None else (mask & cmask)
    if mask is not None:
        contrib = jnp.where(mask, contrib, 0.0)

    acc_ref[...] += contrib

    @pl.when((v == n_v - 1) & (t == n_t - 1))
    def _finalize():
        # Single cross-lane/sublane reduce for the whole kernel.
        o_ref[0, 0] = jnp.sum(acc_ref[...])


def _choose_tiles(V: int, T: int, *, block_budget_bytes: int = 8 << 20):
    """Byte-budgeted (v_tile, t_tile) obeying the (8, 128) / full-dim rule."""
    itemsize = 4  # f32
    # Lane axis (T): full extent if it fits, otherwise a multiple of 128.
    max_lanes = max(128, block_budget_bytes // (8 * itemsize))
    if T <= max_lanes:
        t_tile = T                                   # full-dim block (always legal)
    else:
        t_tile = (max_lanes // 128) * 128
    # Sublane axis (V): whatever fits the budget given t_tile, multiple of 8.
    max_rows = max(8, block_budget_bytes // (t_tile * itemsize))
    if V <= max_rows:
        v_tile = V                                   # full-dim block (always legal)
    else:
        v_tile = (max_rows // 8) * 8
    return v_tile, t_tile


def unigram_forward(x: jax.Array, s: jax.Array,
                    *, block_budget_bytes: int = 8 << 20) -> jax.Array:
    """x: (V, T) float32, s: (V, 1) float32 -> (1, 1) float32."""
    V, T = x.shape
    assert s.shape == (V, 1)

    x = x.astype(jnp.float32)

    # log p = log_sigmoid(s) - logsumexp(log_sigmoid(s)).  V-length vector ->
    # negligible cost in plain JAX, keeps the kernel prologue off the pipeline
    # critical path and enables the native-layout V-blocked stream below.
    log_sig = jax.nn.log_sigmoid(s.astype(jnp.float32).reshape(V))
    logp = (log_sig - jax.nn.logsumexp(log_sig)).reshape(V, 1)

    v_tile, t_tile = _choose_tiles(V, T, block_budget_bytes=block_budget_bytes)
    n_v = pl.cdiv(V, v_tile)
    n_t = pl.cdiv(T, t_tile)

    block_bytes = v_tile * t_tile * 4
    # x double-buffered + block-shaped accumulator + logp / slack headroom;
    # keep well under v7x's 64 MiB physical VMEM.
    vmem_limit = int(min(max(3 * block_bytes + (4 << 20), 16 << 20), 48 << 20))

    cost = pl.CostEstimate(
        flops=2 * V * T,
        transcendentals=0,
        bytes_accessed=4 * (V * T + V + 1),
    )

    kernel = partial(unigram_kernel, vocab=V, tokens=T)

    return pl.pallas_call(
        kernel,
        out_shape=jax.ShapeDtypeStruct((1, 1), jnp.float32),
        grid=(n_v, n_t),
        in_specs=[
            pl.BlockSpec((v_tile, t_tile), lambda v, t: (v, t)),   # streamed x
            pl.BlockSpec((v_tile, 1), lambda v, t: (v, 0)),        # log p column
        ],
        out_specs=pl.BlockSpec((1, 1), lambda v, t: (0, 0),
                               memory_space=pltpu.MemorySpace.SMEM),
        scratch_shapes=[pltpu.VMEM((v_tile, t_tile), jnp.float32)],
        compiler_params=pltpu.CompilerParams(
            dimension_semantics=("arbitrary", "arbitrary"),   # both axes reduce
            vmem_limit_bytes=vmem_limit,
        ),
        cost_estimate=cost,
    )(x, logp)
    # TODO(synk): on v7x, add a leading size-2 "parallel" grid axis splitting the
    # token range across the two TensorCores (per-core (2,1) SMEM partials summed
    # in the wrapper) for up to ~2x on large inputs.


def unigram_reference(x: jax.Array, s: jax.Array) -> jax.Array:
    sig = jax.nn.sigmoid(s.astype(jnp.float32))
    p = sig / jnp.sum(sig)
    counts = jnp.sum(x, axis=1, keepdims=True)                # (V, 1)
    return counts.T @ jnp.log(p)                              # (1, 1)


if __name__ == "__main__":
    V = 32   # vocabulary size
    T = 8    # number of tokens (sequence length)

    # Deterministic parameter init, exactly as in the PyTorch __init__:
    # s0 = logit(ones((V,1))/V) = log(1/V) - log(1 - 1/V)
    p0 = np.full((V, 1), 1.0 / V, dtype=np.float64)
    s0 = (np.log(p0) - np.log(1.0 - p0)).astype(np.float32)
    s = jnp.asarray(s0)

    # Deterministic example input (soft token counts), shape (V, T).
    key = jax.random.PRNGKey(0)
    x = jax.random.uniform(key, (V, T), dtype=jnp.float32)

    out = jax.block_until_ready(unigram_forward(x, s))
    ref = unigram_reference(x, s)

    assert out.shape == (1, 1) and out.dtype == jnp.float32
    np.testing.assert_allclose(np.asarray(out), np.asarray(ref), rtol=1e-5, atol=1e-5)

    print("KERNEL_OK")
</pallas_src>

<mosaic_0001>
module attributes {stable_mosaic.version = 11 : i64} {
  func.func @unigram_kernel(%arg0: i32, %arg1: i32, %arg2: memref<32x8xf32, #tpu.memory_space<vmem>>, %arg3: memref<32x1xf32, #tpu.memory_space<vmem>>, %arg4: memref<1x1xf32, #tpu.memory_space<smem>>, %arg5: memref<32x8xf32, #tpu.memory_space<vmem>>) attributes {dimension_semantics = [#tpu.dimension_semantics<arbitrary>, #tpu.dimension_semantics<arbitrary>], iteration_bounds = array<i64: 1, 1>, scalar_prefetch = 0 : i64, scratch_operands = 1 : i64, tpu.core_type = #tpu.core_type<tc>, window_params = [{transform_indices = @transform_0, window_bounds = array<i64: 32, 8>}, {transform_indices = @transform_1, window_bounds = array<i64: 32, 1>}, {transform_indices = @transform_2, window_bounds = array<i64: 1, 1>}]} {
    %c0_i32 = arith.constant 0 : i32
    %0 = arith.cmpi eq, %arg0, %c0_i32 : i32
    %c0_i32_0 = arith.constant 0 : i32
    %1 = arith.cmpi eq, %arg1, %c0_i32_0 : i32
    %2 = arith.andi %0, %1 : i1
    %3 = arith.extui %2 : i1 to i32
    %c0_i32_1 = arith.constant 0 : i32
    %4 = arith.cmpi ne, %3, %c0_i32_1 : i32
    scf.if %4 {
      %cst = arith.constant 0.000000e+00 : f32
      %17 = vector.broadcast %cst : f32 to vector<32x8xf32>
      %c0_12 = arith.constant 0 : index
      %c0_13 = arith.constant 0 : index
      %18 = vector.load %arg5[%c0_12, %c0_13] : memref<32x8xf32, #tpu.memory_space<vmem>>, vector<32x8xf32>
      tpu.vector_store %arg5[%c0_12, %c0_13], %17 {strides = array<i32>} : memref<32x8xf32, #tpu.memory_space<vmem>>, vector<32x8xf32>,
      %cst_14 = arith.constant 0.000000e+00 : f32
      %c0_15 = arith.constant 0 : index
      %c0_16 = arith.constant 0 : index
      %19 = memref.load %arg4[%c0_15, %c0_16] : memref<1x1xf32, #tpu.memory_space<smem>>
      memref.store %cst_14, %arg4[%c0_15, %c0_16] : memref<1x1xf32, #tpu.memory_space<smem>>
    } else {
    }
    %c0 = arith.constant 0 : index
    %c0_2 = arith.constant 0 : index
    %5 = vector.load %arg2[%c0, %c0_2] : memref<32x8xf32, #tpu.memory_space<vmem>>, vector<32x8xf32>
    %c0_3 = arith.constant 0 : index
    %c0_4 = arith.constant 0 : index
    %6 = vector.load %arg3[%c0_3, %c0_4] : memref<32x1xf32, #tpu.memory_space<vmem>>, vector<32x1xf32>
    %7 = vector.broadcast %6 : vector<32x1xf32> to vector<32x8xf32>
    %8 = arith.mulf %5, %7 : vector<32x8xf32>
    %c0_5 = arith.constant 0 : index
    %c0_6 = arith.constant 0 : index
    %9 = vector.load %arg5[%c0_5, %c0_6] : memref<32x8xf32, #tpu.memory_space<vmem>>, vector<32x8xf32>
    %10 = arith.addf %9, %8 : vector<32x8xf32>
    %c0_7 = arith.constant 0 : index
    %c0_8 = arith.constant 0 : index
    %11 = vector.load %arg5[%c0_7, %c0_8] : memref<32x8xf32, #tpu.memory_space<vmem>>, vector<32x8xf32>
    tpu.vector_store %arg5[%c0_7, %c0_8], %10 {strides = array<i32>} : memref<32x8xf32, #tpu.memory_space<vmem>>, vector<32x8xf32>,
    %c0_i32_9 = arith.constant 0 : i32
    %12 = arith.cmpi eq, %arg0, %c0_i32_9 : i32
    %c0_i32_10 = arith.constant 0 : i32
    %13 = arith.cmpi eq, %arg1, %c0_i32_10 : i32
    %14 = arith.andi %12, %13 : i1
    %15 = arith.extui %14 : i1 to i32
    %c0_i32_11 = arith.constant 0 : i32
    %16 = arith.cmpi ne, %15, %c0_i32_11 : i32
    scf.if %16 {
      %c0_12 = arith.constant 0 : index
      %c0_13 = arith.constant 0 : index
      %17 = vector.load %arg5[%c0_12, %c0_13] : memref<32x8xf32, #tpu.memory_space<vmem>>, vector<32x8xf32>
      %18 = vector.shape_cast %17 : vector<32x8xf32> to vector<1x32x8xf32>
      %cst = arith.constant dense<0.000000e+00> : vector<1xf32>
      %19 = vector.multi_reduction <add>, %18, %cst [1, 2] : vector<1x32x8xf32> to vector<1xf32>
      %20 = vector.shape_cast %19 : vector<1xf32> to vector<1x1x1xf32>
      %21 = vector.extract %20[0, 0, 0] : f32 from vector<1x1x1xf32>
      %c0_14 = arith.constant 0 : index
      %c0_15 = arith.constant 0 : index
      %22 = memref.load %arg4[%c0_14, %c0_15] : memref<1x1xf32, #tpu.memory_space<smem>>
      memref.store %21, %arg4[%c0_14, %c0_15] : memref<1x1xf32, #tpu.memory_space<smem>>
    } else {
    }
    return
  }
  func.func @transform_0(%arg0: i32, %arg1: i32) -> (i32, i32) {
    %c0_i32 = arith.constant 0 : i32
    return %arg0, %arg1 : i32, i32
  }
  func.func @transform_1(%arg0: i32, %arg1: i32) -> (i32, i32) {
    %c0_i32 = arith.constant 0 : i32
    %c0_i32_0 = arith.constant 0 : i32
    return %arg0, %c0_i32 : i32, i32
  }
  func.func @transform_2(%arg0: i32, %arg1: i32) -> (i32, i32) {
    %c0_i32 = arith.constant 0 : i32
    %c0_i32_0 = arith.constant 0 : i32
    %c0_i32_1 = arith.constant 0 : i32
    return %c0_i32, %c0_i32_0 : i32, i32
  }
}

</mosaic_0001>

<bundles_post_ra>
// kernel: tpu_custom_call.1
= control target key start
LH: loop header
LB: loop body
LE: loop exit
PB: predicated region body
PF: predicated region fallthrough
CT: control target
= control target key end

     0   :  { %vm18_vm0 = vcmask 64512   ;;  %v127_v2 = vmov 0   ;;  %v128_v3 = vmov 0.0   ;;  %s193_s0 = inlined_call_operand.vmem [shape: f32[32,8], index: 0, kind: input, shape index: {}]   ;;  %s194_s1 = inlined_call_operand.vmem [shape: f32[32,1], index: 1, kind: input, shape index: {}]   ;;  %s195_s2 = inlined_call_operand.hbm [shape: f32[1,1], index: 2, kind: output, shape index: {}]  }
   0x1   :  { %v31_v0 = vld [vmem:[%s194_s1 + $0x10] sm:$0xff]  ;;  %v29_v1 = vld [vmem:[%s194_s1] sm:$0xff]  ;;  %114 = vset.pattern.permute.xlu1 %v127_v2  ;;  %113 = vset.pattern.permute.xlu0 %v127_v2  ;;  %21 = vst.msk [vmem:[#allocation2 + $0x10] sm:$0xff] %vm18_vm0, %v128_v3  ;;  %19 = vst.msk [vmem:[#allocation2] sm:$0xff] %vm18_vm0, %v128_v3 }
   0x2   :  { %20 = vst.msk [vmem:[#allocation2 + $0x8] sm:$0xff] %vm18_vm0, %v128_v3  ;;  %22 = vst.msk [vmem:[#allocation2 + $0x18] sm:$0xff] %vm18_vm0, %v128_v3  ;;  %45 = vperm.xlu1 %114, %v31_v0   ;;  %35 = vperm.xlu0 %113, %v29_v1  }
   0x3   :  { %7 = vsyncpa [#allocation4], 0  ;;  %v32_v4 = vld [vmem:[%s194_s1 + $0x18] sm:$0xff]  ;;  %v30_v5 = vld [vmem:[%s194_s1 + $0x8] sm:$0xff]  ;;  %s115_s26 = scalar_lea.hbm %s195_s2, 16 }
   0x4   :  { %v27_v6 = vld [vmem:[%s193_s0 + $0x10] sm:$0xff]  ;;  %v25_v7 = vld [vmem:[%s193_s0] sm:$0xff]  ;;  %v28_v14 = vld [vmem:[%s193_s0 + $0x18] sm:$0xff]  ;;  %p116_p0 = scmp.ne.s32.totalorder %s195_s2, %s115_s26  ;;  %p119_p1 = scmp.lt.u32.totalorder %s115_s26, %s195_s2 }
   0x5   :  { %v26_v15 = vld [vmem:[%s193_s0 + $0x8] sm:$0xff] }
   0x6   :  { %50 = vperm.xlu1 %114, %v32_v4   ;;  %40 = vperm.xlu0 %113, %v30_v5   ;;  %p121_p2 = pnand %p119_p1, %p116_p0 }
   0x8   :  { %v59_v9 = vld [vmem:[#allocation2 + $0x10] sm:$0xff]  ;;  %v57_v11 = vld [vmem:[#allocation2] sm:$0xff] }
   0x9   :  { %v60_v19 = vld [vmem:[#allocation2 + $0x18] sm:$0xff]  ;;  %v58_v21 = vld [vmem:[#allocation2 + $0x8] sm:$0xff] }
  0x81   :  { %v46_v8 = vpop.permute.xlu1 %45  ;;  %v36_v10 = vpop.permute.xlu0 %35 }
  0x82   :  { %v55_v12 = vmul.f32 %v46_v8, %v27_v6  ;;  %v53_v13 = vmul.f32 %v36_v10, %v25_v7 }
  0x84   :  { %v63_v16 = vadd.f32 %v59_v9, %v55_v12  ;;  %v61_v17 = vadd.f32 %v57_v11, %v53_v13 }
  0x85   :  { %v51_v18 = vpop.permute.xlu1 %50  ;;  %v41_v20 = vpop.permute.xlu0 %40 }
  0x86   :  { %68 = vst.msk [vmem:[#allocation2 + $0x10] sm:$0xff] %vm18_vm0, %v63_v16  ;;  %66 = vst.msk [vmem:[#allocation2] sm:$0xff] %vm18_vm0, %v61_v17  ;;  %v56_v22 = vmul.f32 %v51_v18, %v28_v14  ;;  %v54_v23 = vmul.f32 %v41_v20, %v26_v15 }
  0x88   :  { %v64_v24 = vadd.f32 %v60_v19, %v56_v22  ;;  %v62_v25 = vadd.f32 %v58_v21, %v54_v23 }
  0x8a   :  { %69 = vst.msk [vmem:[#allocation2 + $0x18] sm:$0xff] %vm18_vm0, %v64_v24  ;;  %67 = vst.msk [vmem:[#allocation2 + $0x8] sm:$0xff] %vm18_vm0, %v62_v25 }
  0x8d   :  { %v72_v26 = vld [vmem:[#allocation2] sm:$0xff]  ;;  %v74_v28 = vld [vmem:[#allocation2 + $0x10] sm:$0xff] }
  0x8e   :  { %v76_v29 = vsel %vm18_vm0, %v72_v26, 0.0  ;;  %v79_v33 = vsel %vm18_vm0, %v74_v28, 0.0 }
  0x91   :  { %v73_v27 = vld [vmem:[#allocation2 + $0x8] sm:$0xff]  ;;  %v75_v31 = vld [vmem:[#allocation2 + $0x18] sm:$0xff] }
  0x92   :  { %v77_v30 = vsel %vm18_vm0, %v73_v27, 0.0  ;;  %v81_v35 = vsel %vm18_vm0, %v75_v31, 0.0 }
  0x93   :  { %v78_v32 = vadd.f32 %v77_v30, %v76_v29 }
  0x95   :  { %v80_v34 = vadd.f32 %v79_v33, %v78_v32 }
  0x97   :  { %v82_v36 = vadd.f32 %v81_v35, %v80_v34 }
  0x99   :  { %83 = vadd.xlane.f32.xlu0 %v82_v36 }
 0x126   :  { %v84_v37 = vpop.xlane.xlu0 %83 }
 0x127   :  { %v85_v38 = vrot.slane %v84_v37, 4 }
 0x129   :  { %v86_v39 = vadd.f32 %v85_v38, %v84_v37 }
 0x12b   :  { %v87_v40 = vrot.slane %v86_v39, 2 }
 0x12d   :  { %v88_v41 = vadd.f32 %v87_v40, %v86_v39 }
 0x12f   :  { %v89_v42 = vrot.slane %v88_v41, 1 }
 0x131   :  { %v90_v43 = vadd.f32 %v89_v42, %v88_v41 }
 0x133   :  { %107 = vpush %v90_v43 }
 0x164   :  { %s108_s0 = spop %107 }
 0x165   :  { %93 = sst [smem:[#allocation3]] %s108_s0 }
 0x166   :  { %124 = shalt.err (!%p121_p2)
}
 0x167   :  { %s129_s3 = smov [#allocation3]  }
 0x168   :  { %101 = dma.smem_to_hbm %s129_s3, 16, %s195_s2, [#allocation4]  }
 0x169   :  { %125 = dma.done.wait [#allocation4], 16  }
 0x16a   :  { %126 = vsyncadd [#allocation4], 4294967280 }
 0x16b   :  { %105 = sfence }
 0x16c   :  { %106 = vsyncpa [#allocation4], 1 }

</bundles_post_ra>
